<compile_context>
chip_gen: v6e
topology: v6e:2x2x1
jax: 0.10.0
libtpu: 0.0.40
codegen_flags: <defaults>
</compile_context>

<pallas_src>
import functools

import jax
import jax.numpy as jnp
from jax.experimental import pallas as pl
from jax.experimental.pallas import tpu as pltpu

N_INTERVALS = 16  # N in the PyTorch module


def _pwla_kernel(thr_ref, slope_ref, icpt_ref, x_ref, o_ref, *, n):
    # thr_ref  : SMEM (n+1,) -> thresholds [Bl, Bl+d, ..., Bl+(n-1)d, Br]
    # slope_ref: SMEM (n+2,) -> per-segment slope     (seg 0 = x < Bl,
    #                           segs 1..n = interior, seg n+1 = x >= Br)
    # icpt_ref : SMEM (n+2,) -> per-segment intercept (y = slope*x + icpt)
    #
    # Hoist every SMEM scalar read to the top of the body so the sld's stay
    # loop-invariant w.r.t. Mosaic's per-vreg strip loop (kernel is VALU-bound).
    thr = [thr_ref[j] for j in range(n + 1)]
    slp = [slope_ref[j] for j in range(n + 2)]
    icp = [icpt_ref[j] for j in range(n + 2)]

    x = x_ref[...]                                   # (tile_m, W) float32

    # Direct threshold select chain: start from the left-extrapolation segment
    # and overwrite whenever x clears the next breakpoint (17 cmp + 2 sel
    # levels for n=16).  Tiny-table "gather" with no floor/clip/index math.
    slope = jnp.full_like(x, slp[0])
    icpt = jnp.full_like(x, icp[0])
    for j in range(1, n + 2):
        m = x >= thr[j - 1]
        slope = jnp.where(m, slp[j], slope)
        icpt = jnp.where(m, icp[j], icpt)

    o_ref[...] = x * slope + icpt


def _build_tables(params, yidx, n):
    """Fold breakpoints/slopes into threshold / slope / intercept tables.

    Segment layout (n+2 segments):
      seg 0   : x <  Bl                    y = (x - Bl )*Kl  + Y[0]
      seg j   : Bl+(j-1)d <= x (< next)    y = (x - b_j)*K_j + Y[j-1], j=1..n
      seg n+1 : x >= Br                    y = (x - Br )*Kr  + Y[n]
    each folded into y = slope*x + intercept.
    """
    params = params.astype(jnp.float32)
    yidx = yidx.astype(jnp.float32)
    bl, br, kl, kr = params[0], params[1], params[2], params[3]
    # NOTE: degenerate Br == Bl gives d == 0 and garbage slopes, matching the
    # PyTorch module's own division-by-zero behavior; not checked here.
    d = (br - bl) / n
    j = jnp.arange(n, dtype=jnp.float32)
    b_edge = bl + j * d                               # interval left edges
    k_int = (yidx[1:] - yidx[:-1]) / d                # interior slopes

    thresh = jnp.concatenate([b_edge, br.reshape(1)])               # (n+1,)
    slope = jnp.concatenate([kl.reshape(1), k_int, kr.reshape(1)])  # (n+2,)
    icpt = jnp.concatenate([
        (yidx[0] - kl * bl).reshape(1),               # left:  (x-Bl)*Kl + Y[0]
        yidx[:-1] - k_int * b_edge,                   # mid:   (x-b_j)*K_j + Y[j-1]
        (yidx[n] - kr * br).reshape(1),               # right: (x-Br)*Kr + Y[N]
    ])                                                # (n+2,)
    return thresh, slope, icpt


def _select_tiling():
    """(max_tile_m, vmem_limit_bytes) safe on every TPU generation.

    Default 1024-row tiles -> 4 MiB blocks -> 16 MiB double-buffered in+out
    under a 32 MiB scope (fits v7x's 64 MiB VMEM and v5e's small default
    scope).  Chips reporting >= 96 MiB VMEM (v5e/v6e: 128 MiB) get 2048-row
    tiles / 48 MiB scope to further amortize per-grid-step overhead.
    """
    max_tile_m, vmem_limit = 1024, 32 * 1024 * 1024
    try:
        info = pltpu.get_tpu_info()
        vmem = getattr(info, "vmem_capacity_bytes", None)
        if vmem is not None and int(vmem) >= 96 * 1024 * 1024:
            max_tile_m, vmem_limit = 2048, 48 * 1024 * 1024
    except Exception:
        pass  # conservative universal fallback
    return max_tile_m, vmem_limit


def pwla2d_forward(x, params, yidx, *, n=N_INTERVALS):
    """x: (B, C, L) float32. params: (4,) = [Bl, Br, Kl, Kr]. yidx: (n+1,)."""
    orig_shape = x.shape
    orig_dtype = x.dtype
    total = 1
    for s in orig_shape:
        total *= int(s)

    # Lane-dense slab width: largest multiple of 128 dividing the element
    # count, so aligned inputs need no pad/copy at all.  Ragged sizes fall
    # back to a <= W-1 element zero pad (tiny concatenate) + trailing slice.
    W = 1024
    for w in (1024, 512, 256, 128):
        if total % w == 0:
            W = w
            break
    pad = (-total) % W
    rows = (total + pad) // W

    xf = jnp.reshape(x.astype(jnp.float32), (-1,))
    if pad:
        xf = jnp.concatenate([xf, jnp.zeros((pad,), jnp.float32)])
    x2d = xf.reshape(rows, W)

    max_tile_m, vmem_limit = _select_tiling()
    if rows <= 8:
        tile_m = rows                                 # full-extent block
    else:
        # >= 2 grid steps whenever possible (lets megacore chips shard the
        # row axis); round the tile up to the sublane multiple of 8.
        tile_m = min(max_tile_m, ((pl.cdiv(rows, 2) + 7) // 8) * 8)
    grid = pl.cdiv(rows, tile_m)                      # partial last block is masked

    thresh, slope, icpt = _build_tables(params, yidx, n)

    kernel = functools.partial(_pwla_kernel, n=n)
    out2d = pl.pallas_call(
        kernel,
        out_shape=jax.ShapeDtypeStruct((rows, W), jnp.float32),
        grid_spec=pltpu.PrefetchScalarGridSpec(
            num_scalar_prefetch=0,
            grid=(grid,),
            in_specs=[
                pl.BlockSpec(memory_space=pltpu.MemorySpace.SMEM),  # thresholds
                pl.BlockSpec(memory_space=pltpu.MemorySpace.SMEM),  # slopes
                pl.BlockSpec(memory_space=pltpu.MemorySpace.SMEM),  # intercepts
                pl.BlockSpec((tile_m, W), lambda i: (i, 0)),        # x tile
            ],
            out_specs=pl.BlockSpec((tile_m, W), lambda i: (i, 0)),
        ),
        compiler_params=pltpu.CompilerParams(
            # TODO(synk): on v7x verify 2-TC occupancy in xprof; if only one
            # TensorCore runs, switch this axis to pltpu.CORE_PARALLEL.
            dimension_semantics=("parallel",),
            vmem_limit_bytes=vmem_limit,
        ),
    )(thresh, slope, icpt, x2d)

    if pad:
        out = out2d.reshape(-1)[:total].reshape(orig_shape)
    else:
        out = out2d.reshape(orig_shape)
    if out.dtype != orig_dtype:
        out = out.astype(orig_dtype)
    return out


def pwla2d_reference(x, params, yidx, *, n=N_INTERVALS):
    """Pure-JAX reference mirroring the PyTorch forward (mode=1)."""
    bl, br, kl, kr = params[0], params[1], params[2], params[3]
    d = (br - bl) / n
    idx_f = jnp.clip(jnp.floor((x - bl) / d), 0.0, float(n - 1))
    idx = idx_f.astype(jnp.int32)
    bdata = bl + idx_f * d
    mask_bl = x < bl
    mask_br = x >= br
    mask_other = jnp.logical_not(jnp.logical_or(mask_bl, mask_br))
    ydata = yidx[idx]
    kdata = (yidx[idx + 1] - yidx[idx]) / d
    return (mask_bl * ((x - bl) * kl + yidx[0])
            + mask_br * ((x - br) * kr + yidx[-1])
            + mask_other * ((x - bdata) * kdata + ydata))


# TODO(synk): mode=0 (running_mean/std momentum statistics + relu) is a
# training-time stats/buffer-update pass, not the mode=1 forward implemented
# here.

if __name__ == "__main__":
    # Deterministic parameter init matching PWLA2d.__init__ (N=16):
    #   Br=5.0, Bl=-5.0, Kl=0.0, Kr=1.0, Yidx = relu(linspace(-5, 5, 17))
    n = N_INTERVALS
    Bl, Br, Kl, Kr = -5.0, 5.0, 0.0, 1.0
    params = jnp.array([Bl, Br, Kl, Kr], dtype=jnp.float32)
    yidx = jax.nn.relu(jnp.linspace(Bl, Br, n + 1, dtype=jnp.float32))

    key = jax.random.PRNGKey(0)
    k_ragged, k_aligned = jax.random.split(key)

    # (B, C, L) inputs scaled so values span [-5, 5) plus both extrapolation
    # regions:
    #   * (2, 4, 200): ragged element count -> exercises the pad fallback.
    #   * (4, 8, 512): 1024-aligned         -> zero-copy path, 2-step grid.
    cases = [((2, 4, 200), k_ragged), ((4, 8, 512), k_aligned)]
    for shape, k in cases:
        x = 6.0 * jax.random.normal(k, shape, dtype=jnp.float32)
        out = jax.block_until_ready(pwla2d_forward(x, params, yidx, n=n))
        ref = pwla2d_reference(x, params, yidx, n=n)
        assert out.shape == x.shape and out.dtype == x.dtype
        assert jnp.allclose(out, ref, atol=1e-5, rtol=1e-5), (
            shape, float(jnp.max(jnp.abs(out - ref))))

    print("KERNEL_OK")
</pallas_src>

<mosaic_0001>
module attributes {stable_mosaic.version = 11 : i64} {
  func.func @_pwla_kernel(%arg0: i32, %arg1: memref<17xf32, #tpu.memory_space<smem>>, %arg2: memref<18xf32, #tpu.memory_space<smem>>, %arg3: memref<18xf32, #tpu.memory_space<smem>>, %arg4: memref<2x1024xf32, #tpu.memory_space<vmem>>, %arg5: memref<2x1024xf32, #tpu.memory_space<vmem>>) attributes {dimension_semantics = [#tpu.dimension_semantics<parallel>], iteration_bounds = array<i64: 1>, scalar_prefetch = 0 : i64, scratch_operands = 0 : i64, tpu.core_type = #tpu.core_type<tc>, window_params = [{transform_indices = @transform_0, window_bounds = array<i64: 17>}, {transform_indices = @transform_1, window_bounds = array<i64: 18>}, {transform_indices = @transform_2, window_bounds = array<i64: 18>}, {transform_indices = @transform_3, window_bounds = array<i64: 2, 1024>}, {transform_indices = @transform_4, window_bounds = array<i64: 2, 1024>}]} {
    %c0 = arith.constant 0 : index
    %0 = memref.load %arg1[%c0] : memref<17xf32, #tpu.memory_space<smem>>
    %c1 = arith.constant 1 : index
    %1 = memref.load %arg1[%c1] : memref<17xf32, #tpu.memory_space<smem>>
    %c2 = arith.constant 2 : index
    %2 = memref.load %arg1[%c2] : memref<17xf32, #tpu.memory_space<smem>>
    %c3 = arith.constant 3 : index
    %3 = memref.load %arg1[%c3] : memref<17xf32, #tpu.memory_space<smem>>
    %c4 = arith.constant 4 : index
    %4 = memref.load %arg1[%c4] : memref<17xf32, #tpu.memory_space<smem>>
    %c5 = arith.constant 5 : index
    %5 = memref.load %arg1[%c5] : memref<17xf32, #tpu.memory_space<smem>>
    %c6 = arith.constant 6 : index
    %6 = memref.load %arg1[%c6] : memref<17xf32, #tpu.memory_space<smem>>
    %c7 = arith.constant 7 : index
    %7 = memref.load %arg1[%c7] : memref<17xf32, #tpu.memory_space<smem>>
    %c8 = arith.constant 8 : index
    %8 = memref.load %arg1[%c8] : memref<17xf32, #tpu.memory_space<smem>>
    %c9 = arith.constant 9 : index
    %9 = memref.load %arg1[%c9] : memref<17xf32, #tpu.memory_space<smem>>
    %c10 = arith.constant 10 : index
    %10 = memref.load %arg1[%c10] : memref<17xf32, #tpu.memory_space<smem>>
    %c11 = arith.constant 11 : index
    %11 = memref.load %arg1[%c11] : memref<17xf32, #tpu.memory_space<smem>>
    %c12 = arith.constant 12 : index
    %12 = memref.load %arg1[%c12] : memref<17xf32, #tpu.memory_space<smem>>
    %c13 = arith.constant 13 : index
    %13 = memref.load %arg1[%c13] : memref<17xf32, #tpu.memory_space<smem>>
    %c14 = arith.constant 14 : index
    %14 = memref.load %arg1[%c14] : memref<17xf32, #tpu.memory_space<smem>>
    %c15 = arith.constant 15 : index
    %15 = memref.load %arg1[%c15] : memref<17xf32, #tpu.memory_space<smem>>
    %c16 = arith.constant 16 : index
    %16 = memref.load %arg1[%c16] : memref<17xf32, #tpu.memory_space<smem>>
    %c0_0 = arith.constant 0 : index
    %17 = memref.load %arg2[%c0_0] : memref<18xf32, #tpu.memory_space<smem>>
    %c1_1 = arith.constant 1 : index
    %18 = memref.load %arg2[%c1_1] : memref<18xf32, #tpu.memory_space<smem>>
    %c2_2 = arith.constant 2 : index
    %19 = memref.load %arg2[%c2_2] : memref<18xf32, #tpu.memory_space<smem>>
    %c3_3 = arith.constant 3 : index
    %20 = memref.load %arg2[%c3_3] : memref<18xf32, #tpu.memory_space<smem>>
    %c4_4 = arith.constant 4 : index
    %21 = memref.load %arg2[%c4_4] : memref<18xf32, #tpu.memory_space<smem>>
    %c5_5 = arith.constant 5 : index
    %22 = memref.load %arg2[%c5_5] : memref<18xf32, #tpu.memory_space<smem>>
    %c6_6 = arith.constant 6 : index
    %23 = memref.load %arg2[%c6_6] : memref<18xf32, #tpu.memory_space<smem>>
    %c7_7 = arith.constant 7 : index
    %24 = memref.load %arg2[%c7_7] : memref<18xf32, #tpu.memory_space<smem>>
    %c8_8 = arith.constant 8 : index
    %25 = memref.load %arg2[%c8_8] : memref<18xf32, #tpu.memory_space<smem>>
    %c9_9 = arith.constant 9 : index
    %26 = memref.load %arg2[%c9_9] : memref<18xf32, #tpu.memory_space<smem>>
    %c10_10 = arith.constant 10 : index
    %27 = memref.load %arg2[%c10_10] : memref<18xf32, #tpu.memory_space<smem>>
    %c11_11 = arith.constant 11 : index
    %28 = memref.load %arg2[%c11_11] : memref<18xf32, #tpu.memory_space<smem>>
    %c12_12 = arith.constant 12 : index
    %29 = memref.load %arg2[%c12_12] : memref<18xf32, #tpu.memory_space<smem>>
    %c13_13 = arith.constant 13 : index
    %30 = memref.load %arg2[%c13_13] : memref<18xf32, #tpu.memory_space<smem>>
    %c14_14 = arith.constant 14 : index
    %31 = memref.load %arg2[%c14_14] : memref<18xf32, #tpu.memory_space<smem>>
    %c15_15 = arith.constant 15 : index
    %32 = memref.load %arg2[%c15_15] : memref<18xf32, #tpu.memory_space<smem>>
    %c16_16 = arith.constant 16 : index
    %33 = memref.load %arg2[%c16_16] : memref<18xf32, #tpu.memory_space<smem>>
    %c17 = arith.constant 17 : index
    %34 = memref.load %arg2[%c17] : memref<18xf32, #tpu.memory_space<smem>>
    %c0_17 = arith.constant 0 : index
    %35 = memref.load %arg3[%c0_17] : memref<18xf32, #tpu.memory_space<smem>>
    %c1_18 = arith.constant 1 : index
    %36 = memref.load %arg3[%c1_18] : memref<18xf32, #tpu.memory_space<smem>>
    %c2_19 = arith.constant 2 : index
    %37 = memref.load %arg3[%c2_19] : memref<18xf32, #tpu.memory_space<smem>>
    %c3_20 = arith.constant 3 : index
    %38 = memref.load %arg3[%c3_20] : memref<18xf32, #tpu.memory_space<smem>>
    %c4_21 = arith.constant 4 : index
    %39 = memref.load %arg3[%c4_21] : memref<18xf32, #tpu.memory_space<smem>>
    %c5_22 = arith.constant 5 : index
    %40 = memref.load %arg3[%c5_22] : memref<18xf32, #tpu.memory_space<smem>>
    %c6_23 = arith.constant 6 : index
    %41 = memref.load %arg3[%c6_23] : memref<18xf32, #tpu.memory_space<smem>>
    %c7_24 = arith.constant 7 : index
    %42 = memref.load %arg3[%c7_24] : memref<18xf32, #tpu.memory_space<smem>>
    %c8_25 = arith.constant 8 : index
    %43 = memref.load %arg3[%c8_25] : memref<18xf32, #tpu.memory_space<smem>>
    %c9_26 = arith.constant 9 : index
    %44 = memref.load %arg3[%c9_26] : memref<18xf32, #tpu.memory_space<smem>>
    %c10_27 = arith.constant 10 : index
    %45 = memref.load %arg3[%c10_27] : memref<18xf32, #tpu.memory_space<smem>>
    %c11_28 = arith.constant 11 : index
    %46 = memref.load %arg3[%c11_28] : memref<18xf32, #tpu.memory_space<smem>>
    %c12_29 = arith.constant 12 : index
    %47 = memref.load %arg3[%c12_29] : memref<18xf32, #tpu.memory_space<smem>>
    %c13_30 = arith.constant 13 : index
    %48 = memref.load %arg3[%c13_30] : memref<18xf32, #tpu.memory_space<smem>>
    %c14_31 = arith.constant 14 : index
    %49 = memref.load %arg3[%c14_31] : memref<18xf32, #tpu.memory_space<smem>>
    %c15_32 = arith.constant 15 : index
    %50 = memref.load %arg3[%c15_32] : memref<18xf32, #tpu.memory_space<smem>>
    %c16_33 = arith.constant 16 : index
    %51 = memref.load %arg3[%c16_33] : memref<18xf32, #tpu.memory_space<smem>>
    %c17_34 = arith.constant 17 : index
    %52 = memref.load %arg3[%c17_34] : memref<18xf32, #tpu.memory_space<smem>>
    %c0_35 = arith.constant 0 : index
    %c0_36 = arith.constant 0 : index
    %53 = vector.load %arg4[%c0_35, %c0_36] : memref<2x1024xf32, #tpu.memory_space<vmem>>, vector<2x1024xf32>
    %54 = vector.broadcast %17 : f32 to vector<2x1024xf32>
    %55 = vector.broadcast %35 : f32 to vector<2x1024xf32>
    %56 = vector.broadcast %0 : f32 to vector<2x1024xf32>
    %57 = arith.cmpf oge, %53, %56 : vector<2x1024xf32>
    %58 = vector.broadcast %18 : f32 to vector<2x1024xf32>
    %59 = arith.select %57, %58, %54 : vector<2x1024xi1>, vector<2x1024xf32>
    %60 = vector.broadcast %36 : f32 to vector<2x1024xf32>
    %61 = arith.select %57, %60, %55 : vector<2x1024xi1>, vector<2x1024xf32>
    %62 = vector.broadcast %1 : f32 to vector<2x1024xf32>
    %63 = arith.cmpf oge, %53, %62 : vector<2x1024xf32>
    %64 = vector.broadcast %19 : f32 to vector<2x1024xf32>
    %65 = arith.select %63, %64, %59 : vector<2x1024xi1>, vector<2x1024xf32>
    %66 = vector.broadcast %37 : f32 to vector<2x1024xf32>
    %67 = arith.select %63, %66, %61 : vector<2x1024xi1>, vector<2x1024xf32>
    %68 = vector.broadcast %2 : f32 to vector<2x1024xf32>
    %69 = arith.cmpf oge, %53, %68 : vector<2x1024xf32>
    %70 = vector.broadcast %20 : f32 to vector<2x1024xf32>
    %71 = arith.select %69, %70, %65 : vector<2x1024xi1>, vector<2x1024xf32>
    %72 = vector.broadcast %38 : f32 to vector<2x1024xf32>
    %73 = arith.select %69, %72, %67 : vector<2x1024xi1>, vector<2x1024xf32>
    %74 = vector.broadcast %3 : f32 to vector<2x1024xf32>
    %75 = arith.cmpf oge, %53, %74 : vector<2x1024xf32>
    %76 = vector.broadcast %21 : f32 to vector<2x1024xf32>
    %77 = arith.select %75, %76, %71 : vector<2x1024xi1>, vector<2x1024xf32>
    %78 = vector.broadcast %39 : f32 to vector<2x1024xf32>
    %79 = arith.select %75, %78, %73 : vector<2x1024xi1>, vector<2x1024xf32>
    %80 = vector.broadcast %4 : f32 to vector<2x1024xf32>
    %81 = arith.cmpf oge, %53, %80 : vector<2x1024xf32>
    %82 = vector.broadcast %22 : f32 to vector<2x1024xf32>
    %83 = arith.select %81, %82, %77 : vector<2x1024xi1>, vector<2x1024xf32>
    %84 = vector.broadcast %40 : f32 to vector<2x1024xf32>
    %85 = arith.select %81, %84, %79 : vector<2x1024xi1>, vector<2x1024xf32>
    %86 = vector.broadcast %5 : f32 to vector<2x1024xf32>
    %87 = arith.cmpf oge, %53, %86 : vector<2x1024xf32>
    %88 = vector.broadcast %23 : f32 to vector<2x1024xf32>
    %89 = arith.select %87, %88, %83 : vector<2x1024xi1>, vector<2x1024xf32>
    %90 = vector.broadcast %41 : f32 to vector<2x1024xf32>
    %91 = arith.select %87, %90, %85 : vector<2x1024xi1>, vector<2x1024xf32>
    %92 = vector.broadcast %6 : f32 to vector<2x1024xf32>
    %93 = arith.cmpf oge, %53, %92 : vector<2x1024xf32>
    %94 = vector.broadcast %24 : f32 to vector<2x1024xf32>
    %95 = arith.select %93, %94, %89 : vector<2x1024xi1>, vector<2x1024xf32>
    %96 = vector.broadcast %42 : f32 to vector<2x1024xf32>
    %97 = arith.select %93, %96, %91 : vector<2x1024xi1>, vector<2x1024xf32>
    %98 = vector.broadcast %7 : f32 to vector<2x1024xf32>
    %99 = arith.cmpf oge, %53, %98 : vector<2x1024xf32>
    %100 = vector.broadcast %25 : f32 to vector<2x1024xf32>
    %101 = arith.select %99, %100, %95 : vector<2x1024xi1>, vector<2x1024xf32>
    %102 = vector.broadcast %43 : f32 to vector<2x1024xf32>
    %103 = arith.select %99, %102, %97 : vector<2x1024xi1>, vector<2x1024xf32>
    %104 = vector.broadcast %8 : f32 to vector<2x1024xf32>
    %105 = arith.cmpf oge, %53, %104 : vector<2x1024xf32>
    %106 = vector.broadcast %26 : f32 to vector<2x1024xf32>
    %107 = arith.select %105, %106, %101 : vector<2x1024xi1>, vector<2x1024xf32>
    %108 = vector.broadcast %44 : f32 to vector<2x1024xf32>
    %109 = arith.select %105, %108, %103 : vector<2x1024xi1>, vector<2x1024xf32>
    %110 = vector.broadcast %9 : f32 to vector<2x1024xf32>
    %111 = arith.cmpf oge, %53, %110 : vector<2x1024xf32>
    %112 = vector.broadcast %27 : f32 to vector<2x1024xf32>
    %113 = arith.select %111, %112, %107 : vector<2x1024xi1>, vector<2x1024xf32>
    %114 = vector.broadcast %45 : f32 to vector<2x1024xf32>
    %115 = arith.select %111, %114, %109 : vector<2x1024xi1>, vector<2x1024xf32>
    %116 = vector.broadcast %10 : f32 to vector<2x1024xf32>
    %117 = arith.cmpf oge, %53, %116 : vector<2x1024xf32>
    %118 = vector.broadcast %28 : f32 to vector<2x1024xf32>
    %119 = arith.select %117, %118, %113 : vector<2x1024xi1>, vector<2x1024xf32>
    %120 = vector.broadcast %46 : f32 to vector<2x1024xf32>
    %121 = arith.select %117, %120, %115 : vector<2x1024xi1>, vector<2x1024xf32>
    %122 = vector.broadcast %11 : f32 to vector<2x1024xf32>
    %123 = arith.cmpf oge, %53, %122 : vector<2x1024xf32>
    %124 = vector.broadcast %29 : f32 to vector<2x1024xf32>
    %125 = arith.select %123, %124, %119 : vector<2x1024xi1>, vector<2x1024xf32>
    %126 = vector.broadcast %47 : f32 to vector<2x1024xf32>
    %127 = arith.select %123, %126, %121 : vector<2x1024xi1>, vector<2x1024xf32>
    %128 = vector.broadcast %12 : f32 to vector<2x1024xf32>
    %129 = arith.cmpf oge, %53, %128 : vector<2x1024xf32>
    %130 = vector.broadcast %30 : f32 to vector<2x1024xf32>
    %131 = arith.select %129, %130, %125 : vector<2x1024xi1>, vector<2x1024xf32>
    %132 = vector.broadcast %48 : f32 to vector<2x1024xf32>
    %133 = arith.select %129, %132, %127 : vector<2x1024xi1>, vector<2x1024xf32>
    %134 = vector.broadcast %13 : f32 to vector<2x1024xf32>
    %135 = arith.cmpf oge, %53, %134 : vector<2x1024xf32>
    %136 = vector.broadcast %31 : f32 to vector<2x1024xf32>
    %137 = arith.select %135, %136, %131 : vector<2x1024xi1>, vector<2x1024xf32>
    %138 = vector.broadcast %49 : f32 to vector<2x1024xf32>
    %139 = arith.select %135, %138, %133 : vector<2x1024xi1>, vector<2x1024xf32>
    %140 = vector.broadcast %14 : f32 to vector<2x1024xf32>
    %141 = arith.cmpf oge, %53, %140 : vector<2x1024xf32>
    %142 = vector.broadcast %32 : f32 to vector<2x1024xf32>
    %143 = arith.select %141, %142, %137 : vector<2x1024xi1>, vector<2x1024xf32>
    %144 = vector.broadcast %50 : f32 to vector<2x1024xf32>
    %145 = arith.select %141, %144, %139 : vector<2x1024xi1>, vector<2x1024xf32>
    %146 = vector.broadcast %15 : f32 to vector<2x1024xf32>
    %147 = arith.cmpf oge, %53, %146 : vector<2x1024xf32>
    %148 = vector.broadcast %33 : f32 to vector<2x1024xf32>
    %149 = arith.select %147, %148, %143 : vector<2x1024xi1>, vector<2x1024xf32>
    %150 = vector.broadcast %51 : f32 to vector<2x1024xf32>
    %151 = arith.select %147, %150, %145 : vector<2x1024xi1>, vector<2x1024xf32>
    %152 = vector.broadcast %16 : f32 to vector<2x1024xf32>
    %153 = arith.cmpf oge, %53, %152 : vector<2x1024xf32>
    %154 = vector.broadcast %34 : f32 to vector<2x1024xf32>
    %155 = arith.select %153, %154, %149 : vector<2x1024xi1>, vector<2x1024xf32>
    %156 = vector.broadcast %52 : f32 to vector<2x1024xf32>
    %157 = arith.select %153, %156, %151 : vector<2x1024xi1>, vector<2x1024xf32>
    %158 = arith.mulf %53, %155 : vector<2x1024xf32>
    %159 = arith.addf %158, %157 : vector<2x1024xf32>
    %c0_37 = arith.constant 0 : index
    %c0_38 = arith.constant 0 : index
    %160 = vector.load %arg5[%c0_37, %c0_38] : memref<2x1024xf32, #tpu.memory_space<vmem>>, vector<2x1024xf32>
    tpu.vector_store %arg5[%c0_37, %c0_38], %159 {strides = array<i32>} : memref<2x1024xf32, #tpu.memory_space<vmem>>, vector<2x1024xf32>,
    return
  }
  func.func @transform_0(%arg0: i32) -> i32 {
    %c0_i32 = arith.constant 0 : i32
    %c0_i32_0 = arith.constant 0 : i32
    return %c0_i32 : i32
  }
  func.func @transform_1(%arg0: i32) -> i32 {
    %c0_i32 = arith.constant 0 : i32
    %c0_i32_0 = arith.constant 0 : i32
    return %c0_i32 : i32
  }
  func.func @transform_2(%arg0: i32) -> i32 {
    %c0_i32 = arith.constant 0 : i32
    %c0_i32_0 = arith.constant 0 : i32
    return %c0_i32 : i32
  }
  func.func @transform_3(%arg0: i32) -> (i32, i32) {
    %c0_i32 = arith.constant 0 : i32
    %c0_i32_0 = arith.constant 0 : i32
    return %arg0, %c0_i32 : i32, i32
  }
  func.func @transform_4(%arg0: i32) -> (i32, i32) {
    %c0_i32 = arith.constant 0 : i32
    %c0_i32_0 = arith.constant 0 : i32
    return %arg0, %c0_i32 : i32, i32
  }
}

</mosaic_0001>

<bundles_post_ra>
// kernel: tpu_custom_call.1
= control target key start
LH: loop header
LB: loop body
LE: loop exit
PB: predicated region body
PF: predicated region fallthrough
CT: control target
= control target key end

     0   :  { %9 = vsyncpa [#allocation5], 0  ;;  %s937_s0 = inlined_call_operand.hbm [shape: f32[17], index: 0, kind: input, shape index: {}]   ;;  %s938_s1 = inlined_call_operand.vmem [shape: f32[18], index: 1, kind: input, shape index: {}]   ;;  %s939_s2 = inlined_call_operand.vmem [shape: f32[18], index: 2, kind: input, shape index: {}]   ;;  %s940_s3 = inlined_call_operand.hbm [shape: f32[2,1024], index: 3, kind: input, shape index: {}]   ;;  %s941_s4 = inlined_call_operand.hbm [shape: f32[2,1024], index: 4, kind: output, shape index: {}]  }
   0x1   :  { %10 = vsyncpa [#allocation6], 0 }
   0x2   :  { %11 = vsyncpa [#allocation9], 0 }
   0x3   :  { %12 = vsyncpa [#allocation3], 0 }
   0x4   :  { %13 = vsyncpa [#allocation4], 0  ;;  %s28_s17 = sshll.u32 %s938_s1, 4  ;;  %s436_s18 = smov [#allocation2]   ;;  %s29_s17 = int_to_ptr.vmem [resolvable:$true] %s28_s17 }
   0x5   :  { %21 = dma.hbm_to_smem %s937_s0, 16, %s436_s18, [#allocation5]  }
   0x6   :  { %s362_s21 = scalar_lea.vmem %s29_s17, 16  ;;  %p367_p1 = scmp.lt.s32.totalorder %s29_s17, %s29_s17 }
   0x7   :  { %p363_p0 = scmp.ne.s32.totalorder %s29_s17, %s362_s21  ;;  %p368_p2 = scmp.lt.s32.totalorder %s362_s21, %s362_s21 }
   0x9   :  { %p369_p3 = por %p368_p2, %p367_p1 }
   0xb   :  { %p370_p4 = pnand %p369_p3, %p363_p0 }
   0xd   :  { %373 = shalt.err (!%p370_p4)
}
   0xe   :  { %s437_s22 = smov [#allocation7]   ;;  %s38_s25 = sshll.u32 %s939_s2, 4  ;;  %s39_s25 = int_to_ptr.vmem [resolvable:$true] %s38_s25 }
   0xf   :  { %31 = dma.vmem_to_smem %s29_s17, 16, %s437_s22, [#allocation6]  }
  0x10   :  { %s374_s1 = scalar_lea.vmem %s39_s25, 16  ;;  %p379_p6 = scmp.lt.s32.totalorder %s39_s25, %s39_s25 }
  0x11   :  { %p375_p5 = scmp.ne.s32.totalorder %s39_s25, %s374_s1  ;;  %p380_p7 = scmp.lt.s32.totalorder %s374_s1, %s374_s1 }
  0x13   :  { %p381_p8 = por %p380_p7, %p379_p6 }
  0x15   :  { %p382_p9 = pnand %p381_p8, %p375_p5 }
  0x17   :  { %385 = shalt.err (!%p382_p9)
}
  0x18   :  { %s438_s0 = smov [#allocation8]   ;;  %s439_s26 = smov [#allocation10]  }
  0x19   :  { %41 = dma.vmem_to_smem %s39_s25, 16, %s438_s0, [#allocation9]  }
  0x1a   :  { %s48_s27 = sshll.u32 %s439_s26, 4  ;;  %s49_s27 = int_to_ptr.vmem [resolvable:$true] %s48_s27 }
  0x1b   :  { %s394_s28 = scalar_lea.vmem %s49_s27, 256  ;;  %p399_p11 = scmp.lt.s32.totalorder %s49_s27, %s49_s27 }
  0x1c   :  { %p395_p10 = scmp.ne.s32.totalorder %s49_s27, %s394_s28  ;;  %p400_p12 = scmp.lt.s32.totalorder %s394_s28, %s394_s28 }
  0x1e   :  { %p401_p13 = por %p400_p12, %p399_p11 }
  0x20   :  { %p402_p0 = pnand %p401_p13, %p395_p10 }
  0x22   :  { %405 = shalt.err (!%p402_p0)
}
  0x23   :  { %51 = dma.hbm_to_vmem [thread:$0]  %s940_s3, 256, %s49_s27, [#allocation3]  }
  0x24   :  { %426 = dma.done.wait [#allocation5], 16  }
  0x25   :  { %427 = vsyncadd [#allocation5], 4294967280 }
  0x26   :  { %428 = dma.done.wait [#allocation6], 16  }
  0x27   :  { %429 = vsyncadd [#allocation6], 4294967280 }
  0x28   :  { %430 = dma.done.wait [#allocation9], 16  }
  0x29   :  { %431 = vsyncadd [#allocation9], 4294967280 }
  0x2a   :  { %432 = dma.done.wait [#allocation3], 256  }
  0x2b   :  { %433 = vsyncadd [#allocation3], 4294967040 }
  0x2c   :  { %64 = sfence }
  0x2d   :  { %s65_s30 = sld [smem:[#allocation2]]  ;;  %v508_v0 = vld [vmem:[#allocation10] sm:$0xff]  ;;  %v512_v2 = vld [vmem:[#allocation10 + $0x8] sm:$0xff]  ;;  %v968_v12 = vmov 0  ;;  %v972_v14 = vmov 0  ;;  %v976_v17 = vmov 0 }
  0x2e   :  { %s478_s5 = sld [smem:[#allocation2 + $0x1]]  ;;  %v978_v18 = vmov 0  ;;  %v980_v20 = vmov 0  ;;  %v984_v22 = vmov 0  ;;  %v986_v23 = vmov 0 }
  0x2f   :  { %s480_s6 = sld [smem:[#allocation2 + $0x2]]  ;;  %v988_v25 = vmov 0  ;;  %v992_v29 = vmov 0  ;;  %v994_v30 = vmov 0  ;;  %v996_v31 = vmov 0 }
  0x30   :  { %s482_s7 = sld [smem:[#allocation2 + $0x3]]  ;;  %v1000_v43 = vmov 0  ;;  %v1002_v47 = vmov 0  ;;  %v1004_v55 = vmov 0  ;;  %v1008_v63 = vmov 0 }
  0x31   :  { %s484_s8 = sld [smem:[#allocation2 + $0x4]] }
  0x32   :  { %s486_s3 = sld [smem:[#allocation2 + $0x5]] }
  0x33   :  { %s488_s9 = sld [smem:[#allocation2 + $0x6]]  ;;  %v122_v1 = vstv %s65_s30 }
  0x34   :  { %s490_s10 = sld [smem:[#allocation2 + $0x7]]  ;;  %v131_v3 = vstv %s478_s5  ;;  %vm521_vm0 = vcmp.ge.f32.partialorder %v508_v0, %v122_v1  ;;  %vm530_vm1 = vcmp.ge.f32.partialorder %v512_v2, %v122_v1 }
  0x35   :  { %s492_s11 = sld [smem:[#allocation2 + $0x8]]  ;;  %v140_v4 = vstv %s480_s6  ;;  %vm535_vm2 = vcmp.ge.f32.partialorder %v508_v0, %v131_v3  ;;  %vm544_vm3 = vcmp.ge.f32.partialorder %v512_v2, %v131_v3 }
  0x36   :  { %s494_s12 = sld [smem:[#allocation2 + $0x9]]  ;;  %v149_v6 = vstv %s482_s7  ;;  %v969_v12 = vsel %vm544_vm3, 4294967295, %v968_v12  ;;  %vm549_vm4 = vcmp.ge.f32.partialorder %v508_v0, %v140_v4  ;;  %vm554_vm5 = vcmp.ge.f32.partialorder %v512_v2, %v140_v4 }
  0x37   :  { %s496_s13 = sld [smem:[#allocation2 + $0xa]]  ;;  %v158_v7 = vstv %s484_s8  ;;  %v973_v14 = vsel %vm554_vm5, 4294967295, %v972_v14  ;;  %vm562_vm6 = vcmp.ge.f32.partialorder %v508_v0, %v149_v6  ;;  %vm567_vm7 = vcmp.ge.f32.partialorder %v512_v2, %v149_v6 }
  0x38   :  { %s498_s14 = sld [smem:[#allocation2 + $0xb]]  ;;  %v167_v10 = vstv %s486_s3  ;;  %v977_v17 = vsel %vm567_vm7, 4294967295, %v976_v17  ;;  %vm572_vm8 = vcmp.ge.f32.partialorder %v508_v0, %v158_v7  ;;  %vm580_vm9 = vcmp.ge.f32.partialorder %v512_v2, %v158_v7 }
  0x39   :  { %s500_s15 = sld [smem:[#allocation2 + $0xc]]  ;;  %v176_v11 = vstv %s488_s9  ;;  %v979_v18 = vsel %vm572_vm8, 4294967295, %v978_v18  ;;  %v981_v20 = vsel %vm580_vm9, 4294967295, %v980_v20  ;;  %vm585_vm10 = vcmp.ge.f32.partialorder %v508_v0, %v167_v10 }
  0x3a   :  { %s502_s16 = sld [smem:[#allocation2 + $0xd]]  ;;  %v185_v15 = vstv %s490_s10  ;;  %vm590_vm11 = vcmp.ge.f32.partialorder %v512_v2, %v167_v10  ;;  %vm595_vm12 = vcmp.ge.f32.partialorder %v508_v0, %v176_v11  ;;  %vm603_vm13 = vcmp.ge.f32.partialorder %v512_v2, %v176_v11 }
  0x3b   :  { %s504_s17 = sld [smem:[#allocation2 + $0xe]]  ;;  %v194_v19 = vstv %s492_s11  ;;  %v985_v22 = vsel %vm590_vm11, 4294967295, %v984_v22  ;;  %v987_v23 = vsel %vm595_vm12, 4294967295, %v986_v23  ;;  %v989_v25 = vsel %vm603_vm13, 4294967295, %v988_v25 }
  0x3c   :  { %s506_s18 = sld [smem:[#allocation2 + $0xf]]  ;;  %vm608_vm14 = vcmp.ge.f32.partialorder %v508_v0, %v185_v15  ;;  %v203_v27 = vstv %s494_s12  ;;  %vm617_vm15 = vcmp.ge.f32.partialorder %v512_v2, %v185_v15  ;;  %vm622_vm12 = vcmp.ge.f32.partialorder %v508_v0, %v194_v19 }
  0x3d   :  { %s510_s19 = sld [smem:[#allocation2 + $0x10]]  ;;  %v993_v29 = vsel %vm617_vm15, 4294967295, %v992_v29  ;;  %v995_v30 = vsel %vm622_vm12, 4294967295, %v994_v30  ;;  %vm627_vm13 = vcmp.ge.f32.partialorder %v512_v2, %v194_v19  ;;  %v212_v35 = vstv %s496_s13 }
  0x3e   :  { %s515_s20 = sld [smem:[#allocation7]]  ;;  %v997_v31 = vsel %vm627_vm13, 4294967295, %v996_v31  ;;  %vm647_vm13 = vcmp.ge.f32.partialorder %v508_v0, %v203_v27  ;;  %v221_v51 = vstv %s498_s14  ;;  %v1011_v6 = vmov 0 }
  0x3f   :  { %s518_s21 = sld [smem:[#allocation7 + $0x1]]  ;;  %v230_v59 = vstv %s500_s15  ;;  %v1013_v15 = vmov 0 }
  0x40   :  { %s527_s22 = sld [smem:[#allocation7 + $0x2]] }
  0x41   :  { %s541_s23 = sld [smem:[#allocation7 + $0x3]] }
  0x42   :  { %s559_s24 = sld [smem:[#allocation7 + $0x4]] }
  0x43   :  { %s577_s25 = sld [smem:[#allocation7 + $0x5]] }
  0x44   :  { %s599_s1 = sld [smem:[#allocation7 + $0x6]]  ;;  %v120_v24 = vstv %s515_s20 }
  0x45   :  { %s613_s0 = sld [smem:[#allocation7 + $0x7]]  ;;  %v125_v28 = vstv %s518_s21 }
  0x46   :  { %s631_s26 = sld [smem:[#allocation7 + $0x8]]  ;;  %v126_v32 = vsel %vm521_vm0, %v125_v28, %v120_v24  ;;  %v127_v33 = vsel %vm530_vm1, %v125_v28, %v120_v24  ;;  %v134_v34 = vstv %s527_s22  ;;  %v239_v28 = vstv %s502_s16 }
  0x47   :  { %s639_s27 = sld [smem:[#allocation7 + $0x9]]  ;;  %v135_v36 = vsel %vm535_vm2, %v134_v34, %v126_v32  ;;  %v136_v37 = vsel %vm544_vm3, %v134_v34, %v127_v33  ;;  %v143_v38 = vstv %s541_s23  ;;  %vm659_vm3 = vcmp.ge.f32.partialorder %v512_v2, %v203_v27 }
  0x48   :  { %s651_s28 = sld [smem:[#allocation7 + $0xa]]  ;;  %v144_v40 = vsel %vm549_vm4, %v143_v38, %v135_v36  ;;  %v145_v41 = vsel %vm554_vm5, %v143_v38, %v136_v37  ;;  %v152_v42 = vstv %s559_s24  ;;  %v1001_v43 = vsel %vm659_vm3, 4294967295, %v1000_v43 }
  0x49   :  { %s663_s2 = sld [smem:[#allocation7 + $0xb]]  ;;  %v153_v44 = vsel %vm562_vm6, %v152_v42, %v144_v40  ;;  %v154_v45 = vsel %vm567_vm7, %v152_v42, %v145_v41  ;;  %v161_v46 = vstv %s577_s25  ;;  %vm671_vm5 = vcmp.ge.f32.partialorder %v508_v0, %v212_v35 }
  0x4a   :  { %v1003_v47 = vsel %vm671_vm5, 4294967295, %v1002_v47  ;;  %s675_s29 = sld [smem:[#allocation7 + $0xc]]  ;;  %v162_v48 = vsel %vm572_vm8, %v161_v46, %v153_v44  ;;  %v163_v49 = vsel %vm580_vm9, %v161_v46, %v154_v45  ;;  %v170_v50 = vstv %s599_s1  ;;  %s440_s1 = smov [#allocation11]  }
  0x4b   :  { %s683_s30 = sld [smem:[#allocation7 + $0xd]]  ;;  %v171_v52 = vsel %vm585_vm10, %v170_v50, %v162_v48  ;;  %v172_v53 = vsel %vm590_vm11, %v170_v50, %v163_v49  ;;  %v179_v54 = vstv %s613_s0  ;;  %vm691_vm7 = vcmp.ge.f32.partialorder %v512_v2, %v212_v35  ;;  %s287_s0 = sshll.u32 %s440_s1, 4  ;;  %s288_s0 = int_to_ptr.vmem [resolvable:$true] %s287_s0 }
  0x4c   :  { %v1005_v55 = vsel %vm691_vm7, 4294967295, %v1004_v55  ;;  %s695_s5 = sld [smem:[#allocation7 + $0xe]]  ;;  %vm1006_vm9 = vnez %v987_v23  ;;  %vm1007_vm8 = vnez %v989_v25  ;;  %v188_v58 = vstv %s631_s26  ;;  %s406_s26 = scalar_lea.vmem %s288_s0, 256 }
  0x4d   :  { %v180_v56 = vsel %vm1006_vm9, %v179_v54, %v171_v52  ;;  %v181_v57 = vsel %vm1007_vm8, %v179_v54, %v172_v53  ;;  %s703_s6 = sld [smem:[#allocation7 + $0xf]]  ;;  %v197_v62 = vstv %s639_s27  ;;  %vm711_vm11 = vcmp.ge.f32.partialorder %v508_v0, %v221_v51  ;;  %p407_p1 = scmp.ne.s32.totalorder %s288_s0, %s406_s26 }
  0x4e   :  { %v189_v60 = vsel %vm608_vm14, %v188_v58, %v180_v56  ;;  %v190_v61 = vsel %vm617_vm15, %v188_v58, %v181_v57  ;;  %v1009_v63 = vsel %vm711_vm11, 4294967295, %v1008_v63  ;;  %s715_s7 = sld [smem:[#allocation7 + $0x10]]  ;;  %vm1010_vm8 = vnez %v997_v31  ;;  %p411_p2 = scmp.lt.s32.totalorder %s288_s0, %s288_s0 }
  0x4f   :  { %v198_v1 = vsel %vm622_vm12, %v197_v62, %v189_v60  ;;  %v199_v3 = vsel %vm1010_vm8, %v197_v62, %v190_v61  ;;  %v206_v4 = vstv %s651_s28  ;;  %vm723_vm15 = vcmp.ge.f32.partialorder %v512_v2, %v221_v51  ;;  %s727_s8 = sld [smem:[#allocation7 + $0x11]]  ;;  %p412_p3 = scmp.lt.s32.totalorder %s406_s26, %s406_s26 }
  0x50   :  { %v1012_v6 = vsel %vm723_vm15, 4294967295, %v1011_v6  ;;  %v207_v7 = vsel %vm647_vm13, %v206_v4, %v198_v1  ;;  %v208_v10 = vsel %vm659_vm3, %v206_v4, %v199_v3  ;;  %v215_v11 = vstv %s663_s2  ;;  %s739_s3 = sld [smem:[#allocation8]] }
  0x51   :  { %vm735_vm12 = vcmp.ge.f32.partialorder %v508_v0, %v230_v59  ;;  %v216_v19 = vsel %vm671_vm5, %v215_v11, %v207_v7  ;;  %v217_v24 = vsel %vm691_vm7, %v215_v11, %v208_v10  ;;  %v224_v27 = vstv %s675_s29  ;;  %s332_s9 = sld [smem:[#allocation8 + $0x1]]  ;;  %p413_p4 = por %p412_p3, %p411_p2 }
  0x52   :  { %v1014_v15 = vsel %vm735_vm12, 4294967295, %v1013_v15  ;;  %v225_v32 = vsel %vm711_vm11, %v224_v27, %v216_v19  ;;  %v233_v33 = vstv %s683_s30  ;;  %s750_s10 = sld [smem:[#allocation8 + $0x2]]  ;;  %v226_v34 = vsel %vm723_vm15, %v224_v27, %v217_v24 }
  0x53   :  { %vm755_vm5 = vcmp.ge.f32.partialorder %v512_v2, %v230_v59  ;;  %v1015_v35 = vmov 0  ;;  %v248_v36 = vstv %s504_s17  ;;  %s760_s11 = sld [smem:[#allocation8 + $0x3]]  ;;  %v234_v37 = vsel %vm735_vm12, %v233_v33, %v225_v32  ;;  %p414_p5 = pnand %p413_p4, %p407_p1 }
  0x54   :  { %v1016_v35 = vsel %vm755_vm5, 4294967295, %v1015_v35  ;;  %vm765_vm11 = vcmp.ge.f32.partialorder %v508_v0, %v239_v28  ;;  %v1017_v38 = vmov 0  ;;  %v242_v40 = vstv %s695_s5  ;;  %s770_s12 = sld [smem:[#allocation8 + $0x4]] }
  0x55   :  { %v1018_v38 = vsel %vm765_vm11, 4294967295, %v1017_v38  ;;  %v257_v41 = vstv %s506_s18  ;;  %v266_v42 = vstv %s510_s19  ;;  %s774_s13 = sld [smem:[#allocation8 + $0x5]]  ;;  %v235_v44 = vsel %vm755_vm5, %v233_v33, %v226_v34 }
  0x56   :  { %vm779_vm15 = vcmp.ge.f32.partialorder %v512_v2, %v239_v28  ;;  %vm784_vm12 = vcmp.ge.f32.partialorder %v508_v0, %v248_v36  ;;  %s788_s14 = sld [smem:[#allocation8 + $0x6]]  ;;  %v121_v48 = vstv %s739_s3  ;;  %v243_v49 = vsel %vm765_vm11, %v242_v40, %v234_v37 }
  0x57   :  { %vm794_vm5 = vcmp.ge.f32.partialorder %v512_v2, %v248_v36  ;;  %v251_v51 = vstv %s703_s6  ;;  %s799_s15 = sld [smem:[#allocation8 + $0x7]]  ;;  %v128_v52 = vstv %s332_s9  ;;  %vm802_vm7 = vcmp.ge.f32.partialorder %v508_v0, %v257_v41 }
  0x58   :  { %vm807_vm3 = vcmp.ge.f32.partialorder %v512_v2, %v257_v41  ;;  %vm812_vm11 = vcmp.ge.f32.partialorder %v508_v0, %v266_v42  ;;  %v1029_v56 = vmov 0  ;;  %s816_s16 = sld [smem:[#allocation8 + $0x8]]  ;;  %v129_v57 = vsel %vm521_vm0, %v128_v52, %v121_v48 }
  0x59   :  { %v1030_v56 = vsel %vm812_vm11, 4294967295, %v1029_v56  ;;  %v130_v58 = vsel %vm530_vm1, %v128_v52, %v121_v48  ;;  %v137_v59 = vstv %s750_s10  ;;  %v244_v60 = vsel %vm779_vm15, %v242_v40, %v235_v44  ;;  %s825_s17 = sld [smem:[#allocation8 + $0x9]] }
  0x5a   :  { %v138_v61 = vsel %vm535_vm2, %v137_v59, %v129_v57  ;;  %vm1031_vm11 = vnez %v969_v12  ;;  %v146_v1 = vstv %s760_s11  ;;  %v252_v5 = vsel %vm784_vm12, %v251_v51, %v243_v49  ;;  %s834_s18 = sld [smem:[#allocation8 + $0xa]] }
  0x5b   :  { %v139_v62 = vsel %vm1031_vm11, %v137_v59, %v130_v58  ;;  %v147_v8 = vsel %vm549_vm4, %v146_v1, %v138_v61  ;;  %vm1032_vm0 = vnez %v973_v14  ;;  %v155_v4 = vstv %s770_s12  ;;  %s842_s19 = sld [smem:[#allocation8 + $0xb]] }
  0x5c   :  { %v148_v3 = vsel %vm1032_vm0, %v146_v1, %v139_v62  ;;  %v260_v9 = vstv %s715_s7  ;;  %v156_v12 = vsel %vm562_vm6, %v155_v4, %v147_v8  ;;  %vm1033_vm1 = vnez %v977_v17  ;;  %s854_s20 = sld [smem:[#allocation8 + $0xc]] }
  0x5d   :  { %v157_v7 = vsel %vm1033_vm1, %v155_v4, %v148_v3  ;;  %v164_v10 = vstv %s774_s13  ;;  %vm850_vm2 = vcmp.ge.f32.partialorder %v512_v2, %v266_v42  ;;  %vm1036_vm4 = vnez %v979_v18  ;;  %s863_s21 = sld [smem:[#allocation8 + $0xd]] }
  0x5e   :  { %v165_v14 = vsel %vm1036_vm4, %v164_v10, %v156_v12  ;;  %vm1037_vm11 = vnez %v981_v20  ;;  %v173_v11 = vstv %s788_s14  ;;  %v253_v17 = vsel %vm794_vm5, %v251_v51, %v244_v60  ;;  %s872_s22 = sld [smem:[#allocation8 + $0xe]] }
  0x5f   :  { %v166_v16 = vsel %vm1037_vm11, %v164_v10, %v157_v7  ;;  %v174_v19 = vsel %vm585_vm10, %v173_v11, %v165_v14  ;;  %vm1038_vm6 = vnez %v985_v22  ;;  %v182_v27 = vstv %s799_s15  ;;  %s346_s23 = sld [smem:[#allocation8 + $0xf]] }
  0x60   :  { %v175_v24 = vsel %vm1038_vm6, %v173_v11, %v166_v16  ;;  %v261_v18 = vsel %vm802_vm7, %v260_v9, %v252_v5  ;;  %v183_v20 = vsel %vm1006_vm9, %v182_v27, %v174_v19  ;;  %vm1039_vm0 = vnez %v989_v25  ;;  %s347_s24 = sld [smem:[#allocation8 + $0x10]] }
  0x61   :  { %v184_v28 = vsel %vm1039_vm0, %v182_v27, %v175_v24  ;;  %v191_v32 = vstv %s816_s16  ;;  %v269_v21 = vstv %s727_s8  ;;  %vm1040_vm10 = vnez %v993_v29  ;;  %s348_s25 = sld [smem:[#allocation8 + $0x11]] }
  0x62   :  { %v192_v22 = vsel %vm608_vm14, %v191_v32, %v183_v20  ;;  %v193_v33 = vsel %vm1040_vm10, %v191_v32, %v184_v28  ;;  %v200_v34 = vstv %s825_s17  ;;  %v262_v36 = vsel %vm807_vm3, %v260_v9, %v253_v17 }
  0x63   :  { %vm1041_vm9 = vnez %v995_v30  ;;  %v202_v25 = vsel %vm1010_vm8, %v200_v34, %v193_v33  ;;  %v209_v37 = vstv %s834_s18  ;;  %vm1042_vm14 = vnez %v1001_v43 }
  0x64   :  { %v201_v23 = vsel %vm1041_vm9, %v200_v34, %v192_v22  ;;  %v211_v29 = vsel %vm1042_vm14, %v209_v37, %v202_v25  ;;  %v218_v40 = vstv %s842_s19  ;;  %vm1043_vm1 = vnez %v1030_v56 }
  0x65   :  { %v210_v26 = vsel %vm647_vm13, %v209_v37, %v201_v23  ;;  %v270_v41 = vsel %vm1043_vm1, %v269_v21, %v261_v18  ;;  %vm1044_vm4 = vnez %v1003_v47  ;;  %vm1045_vm11 = vnez %v1005_v55 }
  0x66   :  { %v219_v30 = vsel %vm1044_vm4, %v218_v40, %v210_v26  ;;  %v220_v31 = vsel %vm1045_vm11, %v218_v40, %v211_v29  ;;  %v227_v42 = vstv %s854_s20  ;;  %v271_v44 = vsel %vm850_vm2, %v269_v21, %v262_v36 }
  0x67   :  { %vm1046_vm8 = vnez %v1009_v63  ;;  %vm1047_vm13 = vnez %v1012_v6  ;;  %v236_v48 = vstv %s863_s21  ;;  %vm1048_vm6 = vnez %v1014_v15 }
  0x68   :  { %v228_v39 = vsel %vm1046_vm8, %v227_v42, %v219_v30  ;;  %v229_v43 = vsel %vm1047_vm13, %v227_v42, %v220_v31  ;;  %vm1049_vm0 = vnez %v1016_v35  ;;  %v245_v51 = vstv %s872_s22 }
  0x69   :  { %v237_v49 = vsel %vm1048_vm6, %v236_v48, %v228_v39  ;;  %v238_v47 = vsel %vm1049_vm0, %v236_v48, %v229_v43  ;;  %v275_v55 = vmul.f32 %v270_v41, %v508_v0  ;;  %vm1050_vm10 = vnez %v1018_v38 }
  0x6a   :  { %v246_v52 = vsel %vm1050_vm10, %v245_v51, %v237_v49  ;;  %v247_v63 = vsel %vm779_vm15, %v245_v51, %v238_v47  ;;  %v254_v57 = vstv %s346_s23  ;;  %v276_v6 = vmul.f32 %v271_v44, %v512_v2 }
  0x6b   :  { %v255_v58 = vsel %vm784_vm12, %v254_v57, %v246_v52  ;;  %v256_v15 = vsel %vm794_vm5, %v254_v57, %v247_v63  ;;  %v263_v35 = vstv %s347_s24  ;;  %v272_v45 = vstv %s348_s25 }
  0x6c   :  { %v264_v0 = vsel %vm802_vm7, %v263_v35, %v255_v58  ;;  %v265_v38 = vsel %vm807_vm3, %v263_v35, %v256_v15 }
  0x6d   :  { %v273_v59 = vsel %vm1043_vm1, %v272_v45, %v264_v0  ;;  %v274_v2 = vsel %vm850_vm2, %v272_v45, %v265_v38 }
  0x6e   :  { %v277_v46 = vadd.f32 %v275_v55, %v273_v59  ;;  %v278_v60 = vadd.f32 %v276_v6, %v274_v2 }
  0x70   :  { %279 = vst [vmem:[#allocation11] sm:$0xff] %v277_v46  ;;  %280 = vst [vmem:[#allocation11 + $0x8] sm:$0xff] %v278_v60 }
  0x71   :  { %417 = shalt.err (!%p414_p5)
}
  0x72   :  { %290 = dma.vmem_to_hbm [thread:$0]  %s288_s0, 256, %s941_s4, [#allocation4]  }
  0x73   :  { %434 = dma.done.wait [#allocation4], 256  }
  0x74   :  { %435 = vsyncadd [#allocation4], 4294967040 }
  0x75   :  { %294 = vsyncpa [#allocation3], 1 }
  0x76   :  { %295 = vsyncpa [#allocation4], 1 }
  0x77   :  { %296 = vsyncpa [#allocation5], 1 }
  0x78   :  { %297 = vsyncpa [#allocation6], 1 }
  0x79   :  { %298 = vsyncpa [#allocation9], 1 }

</bundles_post_ra>
